<compile_context>
chip_gen: v6e
topology: v6e:2x2x1
jax: 0.10.0
libtpu: 0.0.40
codegen_flags: <defaults>
</compile_context>

<pallas_src>
import functools

import jax
import jax.numpy as jnp
from jax.experimental import pallas as pl
from jax.experimental.pallas import tpu as pltpu


def _round_up(n: int, m: int) -> int:
    return ((n + m - 1) // m) * m


def mlp_kernel(x_ref,
               w1_ref, b1_ref,
               w2_ref, b2_ref,
               w3_ref, b3_ref,
               w4_ref, b4_ref,
               o_ref):
    # fc1 + relu   (bf16 operands -> MXU, f32 accumulate, f32 VPU epilogue)
    h = jnp.dot(x_ref[...].astype(jnp.bfloat16), w1_ref[...],
                preferred_element_type=jnp.float32)
    h = jnp.maximum(h + b1_ref[...], 0.0)
    # fc2 + relu
    h = jnp.dot(h.astype(jnp.bfloat16), w2_ref[...],
                preferred_element_type=jnp.float32)
    h = jnp.maximum(h + b2_ref[...], 0.0)
    # fc3 + relu
    h = jnp.dot(h.astype(jnp.bfloat16), w3_ref[...],
                preferred_element_type=jnp.float32)
    h = jnp.maximum(h + b3_ref[...], 0.0)
    # out (no activation) — unpadded [tb, out_dim] f32 store
    h = jnp.dot(h.astype(jnp.bfloat16), w4_ref[...],
                preferred_element_type=jnp.float32)
    o_ref[...] = (h + b4_ref[...]).astype(o_ref.dtype)


def prepare_params(params):
    """One-time parameter prep (call OUTSIDE the jitted forward).

    params: list of (W[in, out] f32, b[out] or [1, out] f32)  (W is PyTorch W.T)
    Returns list of (W bf16, b f32 [1, out]).
    """
    return [(w.astype(jnp.bfloat16), b.reshape(1, -1).astype(jnp.float32))
            for (w, b) in params]


@functools.partial(jax.jit, static_argnames=("batch_tile",))
def mlp_forward(x, prepared_params, *, batch_tile: int = 1024):
    """x: [B, input_dim] float32; prepared_params: output of prepare_params().

    Returns [B, output_dim] float32.
    """
    B, in_dim = x.shape
    out_dim = prepared_params[-1][0].shape[1]

    # ---- batch tile: avoid rounding B up to a whole extra tile ----
    n_tiles = -(-B // batch_tile)                 # ceil(B / batch_tile)
    tb = _round_up(-(-B // n_tiles), 8)           # rows per tile, sublane-aligned
    bp = tb * n_tiles                             # padded batch (< B + 8*n_tiles)

    if bp != B:
        x_p = jnp.zeros((bp, in_dim), x.dtype).at[:B, :].set(x)
    else:
        x_p = x

    grid = (n_tiles,)

    flat_args = [x_p]
    in_specs = [pl.BlockSpec((tb, in_dim), lambda i: (i, 0))]
    for (w, b) in prepared_params:
        flat_args.append(w)
        in_specs.append(pl.BlockSpec(w.shape, lambda i: (0, 0)))  # VMEM-resident
        flat_args.append(b)
        in_specs.append(pl.BlockSpec(b.shape, lambda i: (0, 0)))  # VMEM-resident

    flops = 2 * bp * sum(w.shape[0] * w.shape[1] for (w, _) in prepared_params)
    bytes_accessed = (
        bp * in_dim * x.dtype.itemsize
        + bp * out_dim * 4
        + sum(w.size * w.dtype.itemsize + b.size * b.dtype.itemsize
              for (w, b) in prepared_params))

    y_p = pl.pallas_call(
        mlp_kernel,
        out_shape=jax.ShapeDtypeStruct((bp, out_dim), jnp.float32),
        grid_spec=pl.GridSpec(
            grid=grid,
            in_specs=in_specs,
            out_specs=pl.BlockSpec((tb, out_dim), lambda i: (i, 0)),
        ),
        compiler_params=pltpu.CompilerParams(
            dimension_semantics=("parallel",)),
        cost_estimate=pl.CostEstimate(flops=flops, transcendentals=0,
                                      bytes_accessed=bytes_accessed),
    )(*flat_args)

    # Drop batch padding (no-op when bp == B, e.g. B = 8).
    return y_p[:B]


def init_linear(key, in_features, out_features):
    """PyTorch-style init: U(-1/sqrt(fan_in), 1/sqrt(fan_in)).
    Returns W with shape [in, out] (transposed vs. nn.Linear) and b as [1, out]."""
    kw, kb = jax.random.split(key)
    bound = 1.0 / jnp.sqrt(jnp.float32(in_features))
    w = jax.random.uniform(kw, (in_features, out_features), jnp.float32,
                           minval=-bound, maxval=bound)
    b = jax.random.uniform(kb, (1, out_features), jnp.float32,
                           minval=-bound, maxval=bound)
    return w, b


if __name__ == "__main__":
    input_dim = 16
    output_dim = 10
    batch = 8

    key = jax.random.PRNGKey(0)
    k_x, k1, k2, k3, k4 = jax.random.split(key, 5)

    # Parameters matching Network(input_dim=16, output_dim=10)
    params = [
        init_linear(k1, input_dim, 32),
        init_linear(k2, 32, 64),
        init_linear(k3, 64, 128),
        init_linear(k4, 128, output_dim),
    ]
    prepared = prepare_params(params)   # one-time bf16 cast, outside the jit

    x = jax.random.normal(k_x, (batch, input_dim), jnp.float32)

    y = mlp_forward(x, prepared)
    y = jax.block_until_ready(y)

    # Reference in plain JAX, mirroring the kernel arithmetic
    # (bf16 operands into each dot, f32 accumulate, f32 bias/ReLU).
    ref = x
    for i, (w, b) in enumerate(params):
        ref = jnp.dot(ref.astype(jnp.bfloat16), w.astype(jnp.bfloat16),
                      preferred_element_type=jnp.float32) + b
        if i < len(params) - 1:
            ref = jnp.maximum(ref, 0.0)

    assert y.shape == (batch, output_dim)
    assert jnp.allclose(y, ref, atol=2e-2, rtol=2e-2), "mismatch vs reference"

    print("KERNEL_OK")
</pallas_src>

<mosaic_0001>
module attributes {stable_mosaic.version = 11 : i64} {
  func.func @mlp_kernel(%arg0: i32, %arg1: memref<8x16xf32, #tpu.memory_space<vmem>>, %arg2: memref<16x32xbf16, #tpu.memory_space<vmem>>, %arg3: memref<1x32xf32, #tpu.memory_space<vmem>>, %arg4: memref<32x64xbf16, #tpu.memory_space<vmem>>, %arg5: memref<1x64xf32, #tpu.memory_space<vmem>>, %arg6: memref<64x128xbf16, #tpu.memory_space<vmem>>, %arg7: memref<1x128xf32, #tpu.memory_space<vmem>>, %arg8: memref<128x10xbf16, #tpu.memory_space<vmem>>, %arg9: memref<1x10xf32, #tpu.memory_space<vmem>>, %arg10: memref<8x10xf32, #tpu.memory_space<vmem>>) attributes {dimension_semantics = [#tpu.dimension_semantics<parallel>], iteration_bounds = array<i64: 1>, scalar_prefetch = 0 : i64, scratch_operands = 0 : i64, tpu.core_type = #tpu.core_type<tc>, window_params = [{transform_indices = @transform_0, window_bounds = array<i64: 8, 16>}, {pipeline_mode = #tpu.pipeline_mode<synchronous>, transform_indices = @transform_1, window_bounds = array<i64: 16, 32>}, {pipeline_mode = #tpu.pipeline_mode<synchronous>, transform_indices = @transform_2, window_bounds = array<i64: 1, 32>}, {pipeline_mode = #tpu.pipeline_mode<synchronous>, transform_indices = @transform_3, window_bounds = array<i64: 32, 64>}, {pipeline_mode = #tpu.pipeline_mode<synchronous>, transform_indices = @transform_4, window_bounds = array<i64: 1, 64>}, {pipeline_mode = #tpu.pipeline_mode<synchronous>, transform_indices = @transform_5, window_bounds = array<i64: 64, 128>}, {pipeline_mode = #tpu.pipeline_mode<synchronous>, transform_indices = @transform_6, window_bounds = array<i64: 1, 128>}, {pipeline_mode = #tpu.pipeline_mode<synchronous>, transform_indices = @transform_7, window_bounds = array<i64: 128, 10>}, {pipeline_mode = #tpu.pipeline_mode<synchronous>, transform_indices = @transform_8, window_bounds = array<i64: 1, 10>}, {transform_indices = @transform_9, window_bounds = array<i64: 8, 10>}]} {
    %c0 = arith.constant 0 : index
    %c0_0 = arith.constant 0 : index
    %0 = vector.load %arg1[%c0, %c0_0] : memref<8x16xf32, #tpu.memory_space<vmem>>, vector<8x16xf32>
    %1 = arith.truncf %0 : vector<8x16xf32> to vector<8x16xbf16>
    %c0_1 = arith.constant 0 : index
    %c0_2 = arith.constant 0 : index
    %2 = vector.load %arg2[%c0_1, %c0_2] : memref<16x32xbf16, #tpu.memory_space<vmem>>, vector<16x32xbf16>
    %cst = arith.constant dense<0.000000e+00> : vector<8x32xf32>
    %3 = tpu.matmul %1, %2, %cst {dimension_numbers = #tpu.dot_dimension_numbers<[1], [0], [0], [1], [0, 0, 1, 1], [], []>} : vector<8x16xbf16>, vector<16x32xbf16>, vector<8x32xf32> -> vector<8x32xf32>
    %c0_3 = arith.constant 0 : index
    %c0_4 = arith.constant 0 : index
    %4 = vector.load %arg3[%c0_3, %c0_4] : memref<1x32xf32, #tpu.memory_space<vmem>>, vector<1x32xf32>
    %5 = vector.broadcast %4 : vector<1x32xf32> to vector<8x32xf32>
    %6 = arith.addf %3, %5 : vector<8x32xf32>
    %cst_5 = arith.constant 0.000000e+00 : f32
    %7 = vector.broadcast %cst_5 : f32 to vector<8x32xf32>
    %8 = arith.maximumf %6, %7 : vector<8x32xf32>
    %9 = arith.truncf %8 : vector<8x32xf32> to vector<8x32xbf16>
    %c0_6 = arith.constant 0 : index
    %c0_7 = arith.constant 0 : index
    %10 = vector.load %arg4[%c0_6, %c0_7] : memref<32x64xbf16, #tpu.memory_space<vmem>>, vector<32x64xbf16>
    %cst_8 = arith.constant dense<0.000000e+00> : vector<8x64xf32>
    %11 = tpu.matmul %9, %10, %cst_8 {dimension_numbers = #tpu.dot_dimension_numbers<[1], [0], [0], [1], [0, 0, 1, 1], [], []>} : vector<8x32xbf16>, vector<32x64xbf16>, vector<8x64xf32> -> vector<8x64xf32>
    %c0_9 = arith.constant 0 : index
    %c0_10 = arith.constant 0 : index
    %12 = vector.load %arg5[%c0_9, %c0_10] : memref<1x64xf32, #tpu.memory_space<vmem>>, vector<1x64xf32>
    %13 = vector.broadcast %12 : vector<1x64xf32> to vector<8x64xf32>
    %14 = arith.addf %11, %13 : vector<8x64xf32>
    %cst_11 = arith.constant 0.000000e+00 : f32
    %15 = vector.broadcast %cst_11 : f32 to vector<8x64xf32>
    %16 = arith.maximumf %14, %15 : vector<8x64xf32>
    %17 = arith.truncf %16 : vector<8x64xf32> to vector<8x64xbf16>
    %c0_12 = arith.constant 0 : index
    %c0_13 = arith.constant 0 : index
    %18 = vector.load %arg6[%c0_12, %c0_13] : memref<64x128xbf16, #tpu.memory_space<vmem>>, vector<64x128xbf16>
    %cst_14 = arith.constant dense<0.000000e+00> : vector<8x128xf32>
    %19 = tpu.matmul %17, %18, %cst_14 {dimension_numbers = #tpu.dot_dimension_numbers<[1], [0], [0], [1], [0, 0, 1, 1], [], []>} : vector<8x64xbf16>, vector<64x128xbf16>, vector<8x128xf32> -> vector<8x128xf32>
    %c0_15 = arith.constant 0 : index
    %c0_16 = arith.constant 0 : index
    %20 = vector.load %arg7[%c0_15, %c0_16] : memref<1x128xf32, #tpu.memory_space<vmem>>, vector<1x128xf32>
    %21 = vector.broadcast %20 : vector<1x128xf32> to vector<8x128xf32>
    %22 = arith.addf %19, %21 : vector<8x128xf32>
    %cst_17 = arith.constant 0.000000e+00 : f32
    %23 = vector.broadcast %cst_17 : f32 to vector<8x128xf32>
    %24 = arith.maximumf %22, %23 : vector<8x128xf32>
    %25 = arith.truncf %24 : vector<8x128xf32> to vector<8x128xbf16>
    %c0_18 = arith.constant 0 : index
    %c0_19 = arith.constant 0 : index
    %26 = vector.load %arg8[%c0_18, %c0_19] : memref<128x10xbf16, #tpu.memory_space<vmem>>, vector<128x10xbf16>
    %cst_20 = arith.constant dense<0.000000e+00> : vector<8x10xf32>
    %27 = tpu.matmul %25, %26, %cst_20 {dimension_numbers = #tpu.dot_dimension_numbers<[1], [0], [0], [1], [0, 0, 1, 1], [], []>} : vector<8x128xbf16>, vector<128x10xbf16>, vector<8x10xf32> -> vector<8x10xf32>
    %c0_21 = arith.constant 0 : index
    %c0_22 = arith.constant 0 : index
    %28 = vector.load %arg9[%c0_21, %c0_22] : memref<1x10xf32, #tpu.memory_space<vmem>>, vector<1x10xf32>
    %29 = vector.broadcast %28 : vector<1x10xf32> to vector<8x10xf32>
    %30 = arith.addf %27, %29 : vector<8x10xf32>
    %c0_23 = arith.constant 0 : index
    %c0_24 = arith.constant 0 : index
    %31 = vector.load %arg10[%c0_23, %c0_24] : memref<8x10xf32, #tpu.memory_space<vmem>>, vector<8x10xf32>
    tpu.vector_store %arg10[%c0_23, %c0_24], %30 {strides = array<i32>} : memref<8x10xf32, #tpu.memory_space<vmem>>, vector<8x10xf32>,
    return
  }
  func.func @transform_0(%arg0: i32) -> (i32, i32) {
    %c0_i32 = arith.constant 0 : i32
    %c0_i32_0 = arith.constant 0 : i32
    return %arg0, %c0_i32 : i32, i32
  }
  func.func @transform_1(%arg0: i32) -> (i32, i32) {
    %c0_i32 = arith.constant 0 : i32
    %c0_i32_0 = arith.constant 0 : i32
    %c0_i32_1 = arith.constant 0 : i32
    return %c0_i32, %c0_i32_0 : i32, i32
  }
  func.func @transform_2(%arg0: i32) -> (i32, i32) {
    %c0_i32 = arith.constant 0 : i32
    %c0_i32_0 = arith.constant 0 : i32
    %c0_i32_1 = arith.constant 0 : i32
    return %c0_i32, %c0_i32_0 : i32, i32
  }
  func.func @transform_3(%arg0: i32) -> (i32, i32) {
    %c0_i32 = arith.constant 0 : i32
    %c0_i32_0 = arith.constant 0 : i32
    %c0_i32_1 = arith.constant 0 : i32
    return %c0_i32, %c0_i32_0 : i32, i32
  }
  func.func @transform_4(%arg0: i32) -> (i32, i32) {
    %c0_i32 = arith.constant 0 : i32
    %c0_i32_0 = arith.constant 0 : i32
    %c0_i32_1 = arith.constant 0 : i32
    return %c0_i32, %c0_i32_0 : i32, i32
  }
  func.func @transform_5(%arg0: i32) -> (i32, i32) {
    %c0_i32 = arith.constant 0 : i32
    %c0_i32_0 = arith.constant 0 : i32
    %c0_i32_1 = arith.constant 0 : i32
    return %c0_i32, %c0_i32_0 : i32, i32
  }
  func.func @transform_6(%arg0: i32) -> (i32, i32) {
    %c0_i32 = arith.constant 0 : i32
    %c0_i32_0 = arith.constant 0 : i32
    %c0_i32_1 = arith.constant 0 : i32
    return %c0_i32, %c0_i32_0 : i32, i32
  }
  func.func @transform_7(%arg0: i32) -> (i32, i32) {
    %c0_i32 = arith.constant 0 : i32
    %c0_i32_0 = arith.constant 0 : i32
    %c0_i32_1 = arith.constant 0 : i32
    return %c0_i32, %c0_i32_0 : i32, i32
  }
  func.func @transform_8(%arg0: i32) -> (i32, i32) {
    %c0_i32 = arith.constant 0 : i32
    %c0_i32_0 = arith.constant 0 : i32
    %c0_i32_1 = arith.constant 0 : i32
    return %c0_i32, %c0_i32_0 : i32, i32
  }
  func.func @transform_9(%arg0: i32) -> (i32, i32) {
    %c0_i32 = arith.constant 0 : i32
    %c0_i32_0 = arith.constant 0 : i32
    return %arg0, %c0_i32 : i32, i32
  }
}

</mosaic_0001>

<bundles_post_ra>
// kernel: mlp_forward.1
= control target key start
LH: loop header
LB: loop body
LE: loop exit
PB: predicated region body
PF: predicated region fallthrough
CT: control target
= control target key end

     0   :  { %v505_v1 = vmov 0.0   ;;  %vm506_vm0 = vmmov 0   ;;  %vm51_vm1 = vcmask 130048   ;;  %s644_s0 = inlined_call_operand.vmem [shape: f32[8,16], index: 0, kind: input, shape index: {}]   ;;  %s645_s1 = inlined_call_operand.vmem [shape: bf16[16,32], index: 1, kind: input, shape index: {}]   ;;  %s646_s2 = inlined_call_operand.vmem [shape: f32[1,32], index: 2, kind: input, shape index: {}]   ;;  %s647_s3 = inlined_call_operand.vmem [shape: bf16[32,64], index: 3, kind: input, shape index: {}]   ;;  %s648_s4 = inlined_call_operand.vmem [shape: f32[1,64], index: 4, kind: input, shape index: {}]   ;;  %s649_s5 = inlined_call_operand.vmem [shape: bf16[64,128], index: 5, kind: input, shape index: {}]   ;;  %s650_s6 = inlined_call_operand.vmem [shape: f32[1,128], index: 6, kind: input, shape index: {}]   ;;  %s651_s7 = inlined_call_operand.vmem [shape: bf16[128,10], index: 7, kind: input, shape index: {}]   ;;  %s652_s8 = inlined_call_operand.vmem [shape: f32[1,10], index: 8, kind: input, shape index: {}]   ;;  %s653_s9 = inlined_call_operand.hbm [shape: f32[8,10], index: 9, kind: output, shape index: {}]  }
   0x1   :  { %v468_v0 = vld [vmem:[%s645_s1] sm:$0xff]   ;;  %419 = vmatprep.subr.bf16.mxu0 %v505_v1  ;;  %445 = vmatprep.subr.bf16.mxu1 %v505_v1  ;;  %v469_v4 = vld [vmem:[%s647_s3 + $0x8] sm:$0xff]  }
   0x2   :  { %v34_v2 = vld [vmem:[%s644_s0] sm:$0xff]  ;;  %420 = vmatpush3.bf16.msra.mxu0 %v468_v0  ;;  %421 = vmatprep.mubr.msk.bf16.mxu0 %vm506_vm0, %v505_v1 }
   0x3   :  { %v35_v3 = vpack.c.bf16 %v34_v2, %v34_v2  ;;  %425 = vmatprep.subr.bf16.mxu0 %v505_v1  ;;  %461 = vmatprep.mubr.msk.bf16.mxu1 %vm506_vm0, %v505_v1 }
   0x5   :  { %422 = vmatmul.mubr.msk.bf16.vlgmr.msra.gmra.mxu0 %vm51_vm1, %v35_v3 }
   0x6   :  { %426 = vmatpush3.bf16.msra.mxu0 %v469_v4  ;;  %429 = vmatprep.mubr.msk.bf16.mxu0 %vm506_vm0, %v505_v1 }
   0x7   :  { %427 = vmatprep.subr.bf16.mxu0 %v505_v1 }
   0x8   :  { %14 = vsyncpa [#allocation3], 0  ;;  %v470_v5 = vld [vmem:[%s647_s3] sm:$0xff]   ;;  %vm120_vm2 = vcmask 261120   ;;  %v471_v12 = vld [vmem:[%s649_s5 + $0x18] sm:$0xff]   ;;  %vm205_vm3 = vcmask 523264  }
   0x9   :  { %v378_v6 = vld [vmem:[%s646_s2] ss:$0 sm:$0xff]  ;;  %v472_v15 = vld [vmem:[%s649_s5 + $0x10] sm:$0xff]   ;;  %v473_v16 = vld [vmem:[%s649_s5 + $0x8] sm:$0xff]   ;;  %s507_s19 = smov [#allocation2]   ;;  %vm362_vm4 = vcmask 80896  }
   0xa   :  { %428 = vmatpush3.bf16.msra.mxu0 %v470_v5  ;;  %v474_v17 = vld [vmem:[%s649_s5] sm:$0xff]   ;;  %v475_v18 = vld [vmem:[%s651_s7 + $0x38] sm:$0xff]   ;;  %v476_v19 = vld [vmem:[%s651_s7 + $0x30] sm:$0xff]   ;;  %s370_s2 = sshll.u32 %s507_s19, 4  ;;  %s371_s2 = int_to_ptr.vmem [resolvable:$true] %s370_s2 }
   0xb   :  { %433 = vmatprep.subr.bf16.mxu0 %v505_v1  ;;  %446 = vmatpush3.bf16.msra.mxu1 %v475_v18  ;;  %v477_v20 = vld [vmem:[%s651_s7 + $0x28] sm:$0xff]   ;;  %v478_v21 = vld [vmem:[%s651_s7 + $0x20] sm:$0xff]   ;;  %v479_v22 = vld [vmem:[%s651_s7 + $0x18] sm:$0xff]   ;;  %p488_p1 = scmp.lt.s32.totalorder %s371_s2, %s371_s2 }
   0xc   :  { %447 = vmatprep.subr.bf16.mxu1 %v505_v1  ;;  %v480_v23 = vld [vmem:[%s651_s7 + $0x10] sm:$0xff]   ;;  %v381_v24 = vld [vmem:[%s648_s4] ss:$0 sm:$0xff]  ;;  %v481_v32 = vld [vmem:[%s651_s7 + $0x8] sm:$0xff]  }
   0xd   :  { %v482_v33 = vld [vmem:[%s651_s7] sm:$0xff]  }
   0xe   :  { %v385_v34 = vld [vmem:[%s650_s6] ss:$0 sm:$0xff]  ;;  %s483_s6 = scalar_lea.vmem %s371_s2, 128 }
   0xf   :  { %448 = vmatpush3.bf16.msra.mxu1 %v476_v19  ;;  %v391_v42 = vld [vmem:[%s652_s8] ss:$0 sm:$0xff]  ;;  %p484_p0 = scmp.ne.s32.totalorder %s371_s2, %s483_s6  ;;  %p489_p2 = scmp.lt.s32.totalorder %s483_s6, %s483_s6 }
  0x10   :  { %449 = vmatprep.subr.bf16.mxu1 %v505_v1 }
  0x11   :  { %p490_p3 = por %p489_p2, %p488_p1 }
  0x13   :  { %450 = vmatpush3.bf16.msra.mxu1 %v477_v20  ;;  %p491_p4 = pnand %p490_p3, %p484_p0 }
  0x14   :  { %451 = vmatprep.subr.bf16.mxu1 %v505_v1 }
  0x17   :  { %452 = vmatpush3.bf16.msra.mxu1 %v478_v21 }
  0x18   :  { %453 = vmatprep.subr.bf16.mxu1 %v505_v1 }
  0x1b   :  { %454 = vmatpush3.bf16.msra.mxu1 %v479_v22 }
  0x1c   :  { %455 = vmatprep.subr.bf16.mxu1 %v505_v1 }
  0x1f   :  { %456 = vmatpush3.bf16.msra.mxu1 %v480_v23 }
  0x20   :  { %457 = vmatprep.subr.bf16.mxu1 %v505_v1 }
  0x23   :  { %458 = vmatpush3.bf16.msra.mxu1 %v481_v32 }
  0x24   :  { %459 = vmatprep.subr.bf16.mxu1 %v505_v1 }
  0x27   :  { %460 = vmatpush3.bf16.msra.mxu1 %v482_v33 }
  0xc5   :  { %v89_v7 = vpop.f32.mrf.mxu0 }
  0xc6   :  { %v90_v8 = vadd.f32 %v378_v6, %v89_v7 }
  0xc7   :  { %v423_v9 = vpop.f32.mrf.mxu0 }
  0xc8   :  { %v95_v10 = vmax.f32 %v90_v8, 0.0 }
  0xc9   :  { %v92_v11 = vpop.f32.mrf.mxu0 }
  0xca   :  { %v96_v13 = vpack.c.bf16 %v95_v10, %v95_v10 }
  0xcb   :  { %v424_v14 = vpop.f32.mrf.mxu0 }
  0xcc   :  { %430 = vmatmul.mubr.msk.bf16.vlgmr.msra.gmra.mxu0 %vm120_vm2, %v96_v13 }
  0xcd   :  { %434 = vmatpush3.bf16.msra.mxu0 %v471_v12  ;;  %441 = vmatprep.mubr.msk.bf16.mxu0 %vm506_vm0, %v505_v1 }
  0xce   :  { %435 = vmatprep.subr.bf16.mxu0 %v505_v1 }
  0xd1   :  { %436 = vmatpush3.bf16.msra.mxu0 %v472_v15 }
  0xd2   :  { %437 = vmatprep.subr.bf16.mxu0 %v505_v1 }
  0xd5   :  { %438 = vmatpush3.bf16.msra.mxu0 %v473_v16 }
  0xd6   :  { %439 = vmatprep.subr.bf16.mxu0 %v505_v1 }
  0xd9   :  { %440 = vmatpush3.bf16.msra.mxu0 %v474_v17 }
 0x18c   :  { %v158_v25 = vpop.f32.mrf.mxu0 }
 0x18d   :  { %v159_v26 = vadd.f32 %v381_v24, %v158_v25 }
 0x18e   :  { %v431_v27 = vpop.f32.mrf.mxu0 }
 0x18f   :  { %v164_v28 = vmax.f32 %v159_v26, 0.0 }
 0x190   :  { %v161_v29 = vpop.f32.mrf.mxu0 }
 0x191   :  { %v165_v30 = vpack.c.bf16 %v164_v28, %v164_v28 }
 0x192   :  { %v432_v31 = vpop.f32.mrf.mxu0 }
 0x193   :  { %442 = vmatmul.mubr.msk.bf16.vlgmr.msra.gmra.mxu0 %vm205_vm3, %v165_v30 }
 0x253   :  { %v243_v35 = vpop.f32.mrf.mxu0 }
 0x254   :  { %v244_v36 = vadd.f32 %v385_v34, %v243_v35 }
 0x255   :  { %v443_v37 = vpop.f32.mrf.mxu0 }
 0x256   :  { %v249_v38 = vmax.f32 %v244_v36, 0.0 }
 0x257   :  { %v246_v39 = vpop.f32.mrf.mxu0 }
 0x258   :  { %v250_v40 = vpack.c.bf16 %v249_v38, %v249_v38 }
 0x259   :  { %v444_v41 = vpop.f32.mrf.mxu0 }
 0x25a   :  { %462 = vmatmul.mubr.bf16.vlgmr.msra.gmra.mxu1 %v250_v40 }
 0x31a   :  { %v356_v43 = vpop.f32.mrf.mxu1 }
 0x31b   :  { %v357_v44 = vadd.f32 %v391_v42, %v356_v43 }
 0x31c   :  { %v463_v45 = vpop.f32.mrf.mxu1 }
 0x31d   :  { %363 = vst.msk [vmem:[#allocation2] sm:$0xff] %vm362_vm4, %v357_v44 }
 0x31e   :  { %v359_v46 = vpop.f32.mrf.mxu1 }
 0x31f   :  { %494 = shalt.err (!%p491_p4)
}
 0x320   :  { %373 = dma.vmem_to_hbm [thread:$0]  %s371_s2, 128, %s653_s9, [#allocation3]   ;;  %v464_v47 = vpop.f32.mrf.mxu1 }
 0x321   :  { %503 = dma.done.wait [#allocation3], 128  }
 0x322   :  { %504 = vsyncadd [#allocation3], 4294967168 }
 0x323   :  { %377 = vsyncpa [#allocation3], 1 }

</bundles_post_ra>
